<compile_context>
chip_gen: v7x
topology: tpu7x:2x2x1
jax: 0.10.0
libtpu: 0.0.40
codegen_flags: <defaults>
</compile_context>

<pallas_src>
import functools

import jax
import jax.numpy as jnp
from jax import lax
from jax.experimental import pallas as pl
from jax.experimental.pallas import tpu as pltpu

_LANE = 128
_TILE_ROWS = 512                      # rows per grid step in the tiled path
_SMALL_LIMIT_BYTES = 8 * 1024 * 1024  # both arrays VMEM-resident below this


def _softplus(x):
    # Numerically-stable softplus(x) = log(1 + exp(x))
    return jnp.maximum(x, 0.0) + jnp.log1p(jnp.exp(-jnp.abs(x)))


def _lane_dense_2d(x):
    """Free (bitcast) reshape to a lane-dense 2-D view -- no padding, no copy."""
    n = x.size
    if n % _LANE == 0:
        return x.reshape(n // _LANE, _LANE)
    return x.reshape(-1, x.shape[-1])


# --------------------- small path: single resident block ---------------------
def _small_kernel(fake_ref, real_ref, out_ref, *, inv_nf, inv_nr):
    f = fake_ref[...].astype(jnp.float32)
    r = real_ref[...].astype(jnp.float32)
    fake_sum = jnp.sum(_softplus(f))      # BCEWithLogits vs target 0
    real_sum = jnp.sum(_softplus(-r))     # BCEWithLogits vs target 1
    out_ref[0, 0] = 0.5 * (fake_sum * inv_nf + real_sum * inv_nr)


# ------------------ large path: 1-D grid over row tiles ----------------------
def _grid_kernel(fake_ref, real_ref, out_ref, *, rows, inv_nf, inv_nr):
    i = pl.program_id(0)
    last = pl.num_programs(0) - 1

    @pl.when(i == 0)
    def _():
        out_ref[0, 0] = 0.0

    f = fake_ref[...].astype(jnp.float32)
    r = real_ref[...].astype(jnp.float32)
    fl = _softplus(f)
    rl = _softplus(-r)

    tile_r, cols = fake_ref.shape

    # Interior tiles are always fully valid: no mask work at all.
    @pl.when(i < last)
    def _():
        out_ref[0, 0] += jnp.sum(fl) * inv_nf + jnp.sum(rl) * inv_nr

    # Only the final tile can contain out-of-bounds (padded) rows.
    @pl.when(i == last)
    def _():
        row = lax.broadcasted_iota(jnp.int32, (tile_r, cols), 0) + i * tile_r
        valid = (row < rows).astype(jnp.float32)
        out_ref[0, 0] += jnp.sum(fl * valid) * inv_nf + jnp.sum(rl * valid) * inv_nr
        out_ref[0, 0] = 0.5 * out_ref[0, 0]


def _cost(fake2d, real2d):
    n = fake2d.size + real2d.size
    return pl.CostEstimate(
        flops=6 * n,
        transcendentals=2 * n,  # exp + log1p per element
        bytes_accessed=fake2d.size * fake2d.dtype.itemsize
        + real2d.size * real2d.dtype.itemsize
        + 4,
    )


def discriminator_loss(fake_pred, real_pred, *, force_grid=False):
    """(BCEWithLogits(fake, 0) + BCEWithLogits(real, 1)) / 2 as a scalar float32."""
    fake2d = _lane_dense_2d(fake_pred)
    real2d = _lane_dense_2d(real_pred)
    inv_nf = 1.0 / fake_pred.size
    inv_nr = 1.0 / real_pred.size

    total_bytes = (fake2d.size * fake2d.dtype.itemsize
                   + real2d.size * real2d.dtype.itemsize)
    use_grid = (force_grid or total_bytes > _SMALL_LIMIT_BYTES)

    if use_grid and fake2d.shape == real2d.shape:
        rows, cols = fake2d.shape
        tile_r = _TILE_ROWS if rows >= _TILE_ROWS else rows  # mult-of-8 or full dim
        n_steps = pl.cdiv(rows, tile_r)
        out = pl.pallas_call(
            functools.partial(_grid_kernel, rows=rows, inv_nf=inv_nf, inv_nr=inv_nr),
            out_shape=jax.ShapeDtypeStruct((1, 1), jnp.float32),
            grid=(n_steps,),
            in_specs=[
                pl.BlockSpec((tile_r, cols), lambda i: (i, 0)),
                pl.BlockSpec((tile_r, cols), lambda i: (i, 0)),
            ],
            out_specs=pl.BlockSpec(memory_space=pltpu.SMEM),
            compiler_params=pltpu.CompilerParams(
                dimension_semantics=("arbitrary",)),
            cost_estimate=_cost(fake2d, real2d),
        )(fake2d, real2d)
    else:
        # Tiny patchGAN maps: whole arrays resident in VMEM, single invocation.
        out = pl.pallas_call(
            functools.partial(_small_kernel, inv_nf=inv_nf, inv_nr=inv_nr),
            out_shape=jax.ShapeDtypeStruct((1, 1), jnp.float32),
            in_specs=[
                pl.BlockSpec(memory_space=pltpu.VMEM),
                pl.BlockSpec(memory_space=pltpu.VMEM),
            ],
            out_specs=pl.BlockSpec(memory_space=pltpu.SMEM),
            cost_estimate=_cost(fake2d, real2d),
        )(fake2d, real2d)
    return out[0, 0]


def _reference(fake_pred, real_pred):
    f = fake_pred.astype(jnp.float32)
    r = real_pred.astype(jnp.float32)
    fake_loss = jnp.mean(jnp.maximum(f, 0.0) + jnp.log1p(jnp.exp(-jnp.abs(f))))
    real_loss = jnp.mean(jnp.maximum(r, 0.0) - r + jnp.log1p(jnp.exp(-jnp.abs(r))))
    return 0.5 * (fake_loss + real_loss)


if __name__ == "__main__":
    key = jax.random.PRNGKey(0)
    k1, k2, k3, k4 = jax.random.split(key, 4)

    # 1) PatchGAN-style discriminator outputs: NCHW = (2, 1, 16, 16) -> small path.
    fake_pred = jax.random.normal(k1, (2, 1, 16, 16), dtype=jnp.float32)
    real_pred = jax.random.normal(k2, (2, 1, 16, 16), dtype=jnp.float32) + 0.5

    loss = discriminator_loss(fake_pred, real_pred)
    jax.block_until_ready(loss)
    ref = _reference(fake_pred, real_pred)
    assert jnp.allclose(loss, ref, rtol=1e-5, atol=1e-5), (loss, ref)

    # 2) Exercise the tiled/accumulated path (multi-step grid + ragged last tile).
    fake_big = jax.random.normal(k3, (4, 3, 65, 128), dtype=jnp.float32)
    real_big = jax.random.normal(k4, (4, 3, 65, 128), dtype=jnp.float32) + 0.5

    loss_big = discriminator_loss(fake_big, real_big, force_grid=True)
    jax.block_until_ready(loss_big)
    ref_big = _reference(fake_big, real_big)
    assert jnp.allclose(loss_big, ref_big, rtol=1e-5, atol=1e-5), (loss_big, ref_big)

    print("KERNEL_OK")
</pallas_src>

<mosaic_0001>
module attributes {stable_mosaic.version = 11 : i64} {
  func.func @_small_kernel(%arg0: memref<4x128xf32, #tpu.memory_space<vmem>>, %arg1: memref<4x128xf32, #tpu.memory_space<vmem>>, %arg2: memref<1x1xf32, #tpu.memory_space<smem>>) attributes {dimension_semantics = [], scalar_prefetch = 0 : i64, scratch_operands = 0 : i64, tpu.core_type = #tpu.core_type<tc>} {
    %c0 = arith.constant 0 : index
    %c0_0 = arith.constant 0 : index
    %0 = vector.load %arg0[%c0, %c0_0] : memref<4x128xf32, #tpu.memory_space<vmem>>, vector<4x128xf32>
    %c0_1 = arith.constant 0 : index
    %c0_2 = arith.constant 0 : index
    %1 = vector.load %arg1[%c0_1, %c0_2] : memref<4x128xf32, #tpu.memory_space<vmem>>, vector<4x128xf32>
    %cst = arith.constant 0.000000e+00 : f32
    %2 = vector.broadcast %cst : f32 to vector<4x128xf32>
    %3 = arith.maximumf %0, %2 : vector<4x128xf32>
    %4 = math.absf %0 : vector<4x128xf32>
    %cst_3 = arith.constant 0.000000e+00 : f32
    %5 = vector.broadcast %cst_3 : f32 to vector<4x128xf32>
    %6 = arith.subf %5, %4 : vector<4x128xf32>
    %7 = math.exp %6 : vector<4x128xf32>
    %8 = math.log1p %7 : vector<4x128xf32>
    %9 = arith.addf %3, %8 : vector<4x128xf32>
    %10 = vector.shape_cast %9 : vector<4x128xf32> to vector<1x4x128xf32>
    %cst_4 = arith.constant dense<0.000000e+00> : vector<1xf32>
    %11 = vector.multi_reduction <add>, %10, %cst_4 [1, 2] : vector<1x4x128xf32> to vector<1xf32>
    %12 = vector.shape_cast %11 : vector<1xf32> to vector<1x1x1xf32>
    %13 = vector.extract %12[0, 0, 0] : f32 from vector<1x1x1xf32>
    %cst_5 = arith.constant 0.000000e+00 : f32
    %14 = vector.broadcast %cst_5 : f32 to vector<4x128xf32>
    %15 = arith.subf %14, %1 : vector<4x128xf32>
    %cst_6 = arith.constant 0.000000e+00 : f32
    %16 = vector.broadcast %cst_6 : f32 to vector<4x128xf32>
    %17 = arith.maximumf %15, %16 : vector<4x128xf32>
    %18 = math.absf %15 : vector<4x128xf32>
    %cst_7 = arith.constant 0.000000e+00 : f32
    %19 = vector.broadcast %cst_7 : f32 to vector<4x128xf32>
    %20 = arith.subf %19, %18 : vector<4x128xf32>
    %21 = math.exp %20 : vector<4x128xf32>
    %22 = math.log1p %21 : vector<4x128xf32>
    %23 = arith.addf %17, %22 : vector<4x128xf32>
    %24 = vector.shape_cast %23 : vector<4x128xf32> to vector<1x4x128xf32>
    %cst_8 = arith.constant dense<0.000000e+00> : vector<1xf32>
    %25 = vector.multi_reduction <add>, %24, %cst_8 [1, 2] : vector<1x4x128xf32> to vector<1xf32>
    %26 = vector.shape_cast %25 : vector<1xf32> to vector<1x1x1xf32>
    %27 = vector.extract %26[0, 0, 0] : f32 from vector<1x1x1xf32>
    %cst_9 = arith.constant 0.001953125 : f32
    %28 = arith.mulf %13, %cst_9 : f32
    %cst_10 = arith.constant 0.001953125 : f32
    %29 = arith.mulf %27, %cst_10 : f32
    %30 = arith.addf %28, %29 : f32
    %cst_11 = arith.constant 5.000000e-01 : f32
    %31 = arith.mulf %cst_11, %30 : f32
    %c0_12 = arith.constant 0 : index
    %c0_13 = arith.constant 0 : index
    %32 = memref.load %arg2[%c0_12, %c0_13] : memref<1x1xf32, #tpu.memory_space<smem>>
    memref.store %31, %arg2[%c0_12, %c0_13] : memref<1x1xf32, #tpu.memory_space<smem>>
    return
  }
}

</mosaic_0001>

<bundles_post_ra>
// kernel: tpu_custom_call.1
= control target key start
LH: loop header
LB: loop body
LE: loop exit
PB: predicated region body
PF: predicated region fallthrough
CT: control target
= control target key end

     0   :  { %7 = vsyncpa [#allocation3], 0  ;;  %s240_s0 = inlined_call_operand.hbm [shape: f32[4,128], index: 0, kind: input, shape index: {}]   ;;  %s241_s1 = inlined_call_operand.hbm [shape: f32[4,128], index: 1, kind: input, shape index: {}]   ;;  %s242_s2 = inlined_call_operand.hbm [shape: f32[1,1], index: 2, kind: output, shape index: {}]  }
   0x1   :  { %8 = vsyncpa [#allocation6], 0 }
   0x2   :  { %9 = vsyncpa [#allocation4], 0  ;;  %s186_s9 = smov [#allocation2]   ;;  %s187_s11 = smov [#allocation5]  }
   0x3   :  { %s16_s10 = sshll.u32 %s186_s9, 4  ;;  %s26_s12 = sshll.u32 %s187_s11, 4  ;;  %s17_s10 = int_to_ptr.vmem [resolvable:$true] %s16_s10  ;;  %s27_s12 = int_to_ptr.vmem [resolvable:$true] %s26_s12 }
   0x4   :  { %s126_s15 = scalar_lea.hbm %s240_s0, 64 }
   0x5   :  { %p127_p0 = scmp.ne.s32.totalorder %s240_s0, %s126_s15  ;;  %p130_p1 = scmp.lt.u32.totalorder %s126_s15, %s240_s0 }
   0x7   :  { %p132_p2 = pnand %p130_p1, %p127_p0 }
   0x9   :  { %135 = shalt.err (!%p132_p2)
}
   0xa   :  { %s136_s20 = scalar_lea.vmem %s17_s10, 64  ;;  %p141_p4 = scmp.lt.s32.totalorder %s17_s10, %s17_s10 }
   0xb   :  { %p137_p3 = scmp.ne.s32.totalorder %s17_s10, %s136_s20  ;;  %p142_p5 = scmp.lt.s32.totalorder %s136_s20, %s136_s20 }
   0xd   :  { %p143_p6 = por %p142_p5, %p141_p4 }
   0xf   :  { %p144_p7 = pnand %p143_p6, %p137_p3 }
  0x11   :  { %147 = shalt.err (!%p144_p7)
}
  0x12   :  { %19 = dma.hbm_to_vmem [thread:$0]  %s240_s0, 64, %s17_s10, [#allocation3]  }
  0x13   :  { %s148_s25 = scalar_lea.hbm %s241_s1, 64 }
  0x14   :  { %p149_p8 = scmp.ne.s32.totalorder %s241_s1, %s148_s25  ;;  %p152_p9 = scmp.lt.u32.totalorder %s148_s25, %s241_s1 }
  0x16   :  { %p154_p10 = pnand %p152_p9, %p149_p8 }
  0x18   :  { %157 = shalt.err (!%p154_p10)
}
  0x19   :  { %s158_s30 = scalar_lea.vmem %s27_s12, 64  ;;  %p163_p12 = scmp.lt.s32.totalorder %s27_s12, %s27_s12 }
  0x1a   :  { %p159_p11 = scmp.ne.s32.totalorder %s27_s12, %s158_s30  ;;  %p164_p13 = scmp.lt.s32.totalorder %s158_s30, %s158_s30 }
  0x1c   :  { %p165_p0 = por %p164_p13, %p163_p12 }
  0x1e   :  { %p166_p1 = pnand %p165_p0, %p159_p11 }
  0x20   :  { %169 = shalt.err (!%p166_p1)
}
  0x21   :  { %29 = dma.hbm_to_vmem [thread:$0]  %s241_s1, 64, %s27_s12, [#allocation6]  }
  0x22   :  { %180 = dma.done.wait [#allocation3], 64  }
  0x23   :  { %181 = vsyncadd [#allocation3], 4294967232 }
  0x24   :  { %182 = dma.done.wait [#allocation6], 64  }
  0x25   :  { %183 = vsyncadd [#allocation6], 4294967232  ;;  %v36_v0 = vld [vmem:[#allocation2] sm:$0xf]  ;;  %v37_v1 = vld [vmem:[#allocation5] sm:$0xf] }
  0x26   :  { %v39_v2 = vand.u32 2147483647, %v36_v0  ;;  %v64_v3 = vsub.f32 0.0, %v37_v1  ;;  %v38_v21 = vmax.f32 %v36_v0, 0.0  ;;  %vm53_vm2 = vcmask 1043456   ;;  %s170_s11 = scalar_lea.hbm %s242_s2, 16 }
  0x27   :  { %p171_p2 = scmp.ne.s32.totalorder %s242_s2, %s170_s11  ;;  %p174_p3 = scmp.lt.u32.totalorder %s170_s11, %s242_s2 }
  0x28   :  { %v40_v4 = vsub.f32 0.0, %v39_v2  ;;  %v66_v5 = vand.u32 2147483647, %v64_v3  ;;  %v65_v25 = vmax.f32 %v64_v3, 0.0 }
  0x29   :  { %p176_p4 = pnand %p174_p3, %p171_p2 }
  0x2a   :  { %v41_v6 = vmul.f32 1.442695, %v40_v4  ;;  %v67_v7 = vsub.f32 0.0, %v66_v5 }
  0x2c   :  { %118 = vpow2.f32 %v41_v6  ;;  %v68_v8 = vmul.f32 1.442695, %v67_v7 }
  0x2e   :  { %120 = vpow2.f32 %v68_v8 }
  0x36   :  { %v119_v9 = vpop.eup %118 }
  0x37   :  { %v43_v10 = vadd.f32 1.0, %v119_v9  ;;  %v46_v13 = vmul.f32 -0.5, %v119_v9  ;;  %v49_v16 = vand.u32 2147483647, %v119_v9 }
  0x38   :  { %v121_v11 = vpop.eup %120 }
  0x39   :  { %122 = vlog2.f32 %v43_v10  ;;  %v70_v12 = vadd.f32 1.0, %v121_v11  ;;  %v73_v14 = vmul.f32 -0.5, %v121_v11  ;;  %v47_v15 = vadd.f32 1.0, %v46_v13 }
  0x3a   :  { %v76_v18 = vand.u32 2147483647, %v121_v11  ;;  %vm50_vm0 = vcmp.lt.f32.partialorder %v49_v16, 0.0004427343 }
  0x3b   :  { %124 = vlog2.f32 %v70_v12  ;;  %v74_v17 = vadd.f32 1.0, %v73_v14  ;;  %v48_v19 = vmul.f32 %v119_v9, %v47_v15 }
  0x3c   :  { %vm77_vm1 = vcmp.lt.f32.partialorder %v76_v18, 0.0004427343 }
  0x3d   :  { %v75_v23 = vmul.f32 %v121_v11, %v74_v17 }
  0x43   :  { %v123_v20 = vpop.eup %122 }
  0x44   :  { %v45_v22 = vmul.f32 0.6931472, %v123_v20 }
  0x45   :  { %v125_v24 = vpop.eup %124 }
  0x46   :  { %v51_v26 = vsel %vm50_vm0, %v48_v19, %v45_v22  ;;  %v72_v27 = vmul.f32 0.6931472, %v125_v24 }
  0x47   :  { %v52_v28 = vadd.f32 %v51_v26, %v38_v21 }
  0x48   :  { %v78_v29 = vsel %vm77_vm1, %v75_v23, %v72_v27 }
  0x49   :  { %v54_v30 = vsel %vm53_vm2, %v52_v28, 0.0  ;;  %v79_v31 = vadd.f32 %v78_v29, %v65_v25 }
  0x4a   :  { %55 = vadd.xlane.f32.xlu0 %v54_v30 }
  0x4b   :  { %v80_v32 = vsel %vm53_vm2, %v79_v31, 0.0 }
  0x4e   :  { %81 = vadd.xlane.f32.xlu0 %v80_v32 }
  0xd7   :  { %v56_v33 = vpop.xlane.xlu0 %55 }
  0xd8   :  { %v57_v34 = vrot.slane %v56_v33, 4 }
  0xda   :  { %v58_v35 = vadd.f32 %v57_v34, %v56_v33 }
  0xdb   :  { %v82_v36 = vpop.xlane.xlu0 %81 }
  0xdc   :  { %v59_v37 = vrot.slane %v58_v35, 2  ;;  %v83_v38 = vrot.slane %v82_v36, 4 }
  0xde   :  { %v84_v39 = vadd.f32 %v83_v38, %v82_v36  ;;  %v60_v40 = vadd.f32 %v59_v37, %v58_v35 }
  0xe0   :  { %v85_v41 = vrot.slane %v84_v39, 2  ;;  %v61_v42 = vrot.slane %v60_v40, 1 }
  0xe2   :  { %v86_v43 = vadd.f32 %v85_v41, %v84_v39  ;;  %v62_v44 = vadd.f32 %v61_v42, %v60_v40 }
  0xe4   :  { %111 = vpush %v62_v44  ;;  %v87_v45 = vrot.slane %v86_v43, 1 }
  0xe6   :  { %v88_v46 = vadd.f32 %v87_v45, %v86_v43 }
  0xe8   :  { %113 = vpush %v88_v46 }
 0x115   :  { %s112_s1 = spop %111 }
 0x116   :  { %s90_s4 = smul.f32 0.001953125, %s112_s1 }
 0x119   :  { %s114_s5 = spop %113 }
 0x11a   :  { %s91_s6 = smul.f32 0.001953125, %s114_s5 }
 0x11c   :  { %s92_s7 = sadd.f32 %s91_s6, %s90_s4 }
 0x11e   :  { %s93_s8 = smul.f32 0.5, %s92_s7 }
 0x120   :  { %95 = sst [smem:[#allocation7]] %s93_s8 }
 0x121   :  { %179 = shalt.err (!%p176_p4)
}
 0x122   :  { %s188_s16 = smov [#allocation7]  }
 0x123   :  { %103 = dma.smem_to_hbm %s188_s16, 16, %s242_s2, [#allocation4]  }
 0x124   :  { %184 = dma.done.wait [#allocation4], 16  }
 0x125   :  { %185 = vsyncadd [#allocation4], 4294967280 }
 0x126   :  { %107 = sfence }
 0x127   :  { %108 = vsyncpa [#allocation3], 1 }
 0x128   :  { %109 = vsyncpa [#allocation6], 1 }
 0x129   :  { %110 = vsyncpa [#allocation4], 1 }

</bundles_post_ra>
